<compile_context>
chip_gen: v7x
topology: tpu7x:2x2x1
jax: 0.10.0
libtpu: 0.0.40
codegen_flags: <defaults>
</compile_context>

<pallas_src>
import jax
import jax.numpy as jnp
from jax.experimental import pallas as pl
from jax.experimental.pallas import tpu as pltpu


def _round_up(x, m):
    return ((x + m - 1) // m) * m


def _cdiv(a, b):
    return -(-a // b)


def _vmem_budget_and_limit():
    """Generation-aware VMEM sizing: budget ~0.5x capacity, limit ~0.75x."""
    cap = None
    try:
        cap = int(pltpu.get_tpu_info().vmem_capacity_bytes)
    except Exception:
        cap = None
    if not cap or cap <= 0:
        cap = 64 * 1024 * 1024  # conservative fallback: v7x per-core VMEM
    return cap // 2, (cap * 3) // 4


def _num_tensorcores():
    """Best-effort TensorCores-per-chip (v7x: 2, v5e/v6e: 1)."""
    try:
        info = pltpu.get_tpu_info()
        for attr in ("num_cores", "core_count", "tensorcore_count"):
            v = getattr(info, attr, None)
            if isinstance(v, int) and v > 0:
                return v
    except Exception:
        pass
    try:
        dev = jax.devices()[0]
        for attr in ("num_cores", "core_count"):
            v = getattr(dev, attr, None)
            if isinstance(v, int) and v > 0:
                return v
    except Exception:
        pass
    return 2  # assume 2 (v7x-safe); on 1-TC parts the extra grid step is cheap


def _choose_tiles(n, c_in, c_out, in_bytes, out_bytes, budget, num_tc):
    """Pick (row_tile, col_tile, n_row, n_col) for the padded dense tensor."""
    LANE = 128
    SUB = 16  # bf16 sublane packing (also a multiple of the f32 minimum 8)

    n_col0 = _round_up(n, LANE)
    rows_min = _round_up(n, SUB)
    # Double-buffered bytes per (row, col) element per grid step.
    per_elem = 2 * (c_in * in_bytes + c_out * out_bytes)

    # Column tiling only if even a minimal-height full-width stripe overflows.
    if per_elem * SUB * n_col0 <= budget:
        col_tile = n_col0
    else:
        col_tile = max(LANE, (budget // (per_elem * SUB)) // LANE * LANE)
    n_col = _round_up(n, col_tile)
    col_steps = n_col // col_tile

    max_rt = max(SUB, (budget // (per_elem * col_tile)) // SUB * SUB)
    row_tile = min(max_rt, rows_min)

    if num_tc >= 2:
        steps = _cdiv(rows_min, row_tile)
        if steps * col_steps < 2 and rows_min > SUB:
            # Split so both TensorCores get work.
            row_tile = _round_up(_cdiv(rows_min, 2), SUB)
        elif col_steps == 1 and steps > 1 and steps % 2 == 1:
            # Prefer an even row-step count (balanced 2-core split).
            row_tile = _round_up(_cdiv(rows_min, steps + 1), SUB)

    n_row = _round_up(n, row_tile)
    return row_tile, col_tile, n_row, n_col


def _densify_channels(A, c_in, n_row, n_col, dtype):
    """One scatter-add directly into the padded (C_in, n_row, n_col) tensor.

    Duplicate edges are summed in f32 (matching torch_sparse.coalesce), then
    the whole tensor is cast to the streaming dtype (bf16 by default).
    """
    ch = jnp.concatenate(
        [jnp.full((ei.shape[1],), j, jnp.int32) for j, (ei, _) in enumerate(A)])
    rows = jnp.concatenate([ei[0] for ei, _ in A])
    cols = jnp.concatenate([ei[1] for ei, _ in A])
    vals = jnp.concatenate([ev.astype(jnp.float32) for _, ev in A])
    dense = jnp.zeros((c_in, n_row, n_col), jnp.float32)
    dense = dense.at[ch, rows, cols].add(vals)
    return dense.astype(dtype)


def gtconv_kernel(filt_ref, a_ref, o_ref):
    """One (row, col) tile of the weighted channel combination.

    filt_ref : (C_out, C_in) softmax'd weights, resident in SMEM
    a_ref    : (C_in, TR, TC) dense adjacency tile (bf16), VMEM
    o_ref    : (C_out, TR, TC) output tile (f32), VMEM
    """
    c_out, c_in = filt_ref.shape
    # j-outer / o-inner unrolled MAC: each a_ref[j] tile is loaded from VMEM
    # once (not C_out times); accumulation in f32; no (C_out, C_in, TR, TC)
    # broadcast temp is ever materialized.
    a0 = a_ref[0].astype(jnp.float32)
    accs = [filt_ref[o, 0] * a0 for o in range(c_out)]
    for j in range(1, c_in):
        aj = a_ref[j].astype(jnp.float32)
        for o in range(c_out):
            accs[o] = accs[o] + filt_ref[o, j] * aj
    for o in range(c_out):
        o_ref[o] = accs[o].astype(o_ref.dtype)


def gtconv_forward(weight, A, num_nodes, *, in_dtype=jnp.bfloat16,
                   out_dtype=jnp.float32, crop=True, return_dense=False):
    """weight: (C_out, C_in) float; A: list of (edge_index (2,E), edge_value (E,)).

    Returns (C_out, N, N) float32 = einsum('oj,jnm->onm', softmax(weight), A_dense),
    where A_dense is the coalesced dense adjacency stack (streamed as bf16).
    """
    c_out, c_in = weight.shape
    assert len(A) == c_in
    n = num_nodes

    # Softmax over in_channels hoisted out of the kernel: computed once here.
    filt = jax.nn.softmax(weight.astype(jnp.float32), axis=1)

    budget, vmem_limit = _vmem_budget_and_limit()
    num_tc = _num_tensorcores()
    in_bytes = jnp.dtype(in_dtype).itemsize
    out_bytes = jnp.dtype(out_dtype).itemsize
    row_tile, col_tile, n_row, n_col = _choose_tiles(
        n, c_in, c_out, in_bytes, out_bytes, budget, num_tc)

    # Build the dense adjacency DIRECTLY at the padded shape (no jnp.pad pass).
    a_dense = _densify_channels(A, c_in, n_row, n_col, in_dtype)

    grid = (n_row // row_tile, n_col // col_tile)

    out_pad = pl.pallas_call(
        gtconv_kernel,
        out_shape=jax.ShapeDtypeStruct((c_out, n_row, n_col), out_dtype),
        grid_spec=pltpu.PrefetchScalarGridSpec(
            num_scalar_prefetch=0,
            grid=grid,
            in_specs=[
                # Small weight table lives in SMEM; scalar reads are cheap.
                pl.BlockSpec(memory_space=pltpu.MemorySpace.SMEM),
                pl.BlockSpec((c_in, row_tile, col_tile),
                             lambda r, c: (0, r, c)),
            ],
            out_specs=pl.BlockSpec((c_out, row_tile, col_tile),
                                   lambda r, c: (0, r, c)),
        ),
        compiler_params=pltpu.CompilerParams(
            dimension_semantics=("parallel", "parallel"),
            vmem_limit_bytes=int(vmem_limit),
        ),
    )(filt, a_dense)

    out = out_pad
    if crop and (n_row != n or n_col != n):
        # TODO(synk): a dense->COO consumer can skip this crop copy entirely
        #             (padded rows/cols are exact zeros).
        out = out_pad[:, :n, :n]

    if return_dense:
        return out, a_dense
    return out


if __name__ == "__main__":
    key = jax.random.PRNGKey(0)

    in_channels = 4      # number of input sparse adjacency matrices
    out_channels = 2
    num_nodes = 16
    num_edges = 24       # per channel (may contain duplicates -> coalesce sum)

    # Parameters, initialized exactly as reset_parameters() does:
    #   weight <- constant 1, bias is None, scale is an unused buffer.
    weight = jnp.ones((out_channels, in_channels), jnp.float32)
    scale = jnp.array([0.1], jnp.float32)  # unused in forward (kept for parity)

    # Build the input A = [(edge_index_j, edge_value_j)] deterministically.
    A = []
    for j in range(in_channels):
        key, k_idx, k_val = jax.random.split(key, 3)
        edge_index = jax.random.randint(
            k_idx, (2, num_edges), 0, num_nodes, dtype=jnp.int32)
        edge_value = jax.random.normal(k_val, (num_edges,), jnp.float32)
        A.append((edge_index, edge_value))

    # Pallas kernel: weighted channel reduction with hoisted softmax(weight),
    # bf16-streamed adjacency, f32 accumulation.
    out, a_used = gtconv_forward(weight, A, num_nodes, return_dense=True)
    out = jax.block_until_ready(out)

    # Pure-JAX reference on the same bf16-quantized dense adjacency.
    filt_ref = jax.nn.softmax(weight, axis=1)
    a_f32 = a_used.astype(jnp.float32)[:, :num_nodes, :num_nodes]
    ref = jnp.einsum("oj,jnm->onm", filt_ref, a_f32)

    assert out.shape == (out_channels, num_nodes, num_nodes)
    assert jnp.allclose(out, ref, atol=1e-3, rtol=1e-3), "mismatch vs reference"

    print("KERNEL_OK")
</pallas_src>

<mosaic_0001>
module attributes {stable_mosaic.version = 11 : i64} {
  func.func @gtconv_kernel(%arg0: i32, %arg1: i32, %arg2: memref<2x4xf32, #tpu.memory_space<smem>>, %arg3: memref<4x16x128xbf16, #tpu.memory_space<vmem>>, %arg4: memref<2x16x128xf32, #tpu.memory_space<vmem>>) attributes {dimension_semantics = [#tpu.dimension_semantics<parallel>, #tpu.dimension_semantics<parallel>], iteration_bounds = array<i64: 1, 1>, scalar_prefetch = 0 : i64, scratch_operands = 0 : i64, tpu.core_type = #tpu.core_type<tc>, window_params = [{transform_indices = @transform_0, window_bounds = array<i64: 2, 4>}, {transform_indices = @transform_1, window_bounds = array<i64: 4, 16, 128>}, {transform_indices = @transform_2, window_bounds = array<i64: 2, 16, 128>}]} {
    %c0 = arith.constant 0 : index
    %c0_0 = arith.constant 0 : index
    %c0_1 = arith.constant 0 : index
    %0 = vector.load %arg3[%c0, %c0_0, %c0_1] : memref<4x16x128xbf16, #tpu.memory_space<vmem>>, vector<1x16x128xbf16>
    %1 = vector.shape_cast %0 : vector<1x16x128xbf16> to vector<16x128xbf16>
    %2 = arith.extf %1 : vector<16x128xbf16> to vector<16x128xf32>
    %c0_2 = arith.constant 0 : index
    %c0_3 = arith.constant 0 : index
    %3 = memref.load %arg2[%c0_2, %c0_3] : memref<2x4xf32, #tpu.memory_space<smem>>
    %4 = vector.broadcast %3 : f32 to vector<16x128xf32>
    %5 = arith.mulf %4, %2 : vector<16x128xf32>
    %c1 = arith.constant 1 : index
    %c0_4 = arith.constant 0 : index
    %6 = memref.load %arg2[%c1, %c0_4] : memref<2x4xf32, #tpu.memory_space<smem>>
    %7 = vector.broadcast %6 : f32 to vector<16x128xf32>
    %8 = arith.mulf %7, %2 : vector<16x128xf32>
    %c1_5 = arith.constant 1 : index
    %c0_6 = arith.constant 0 : index
    %c0_7 = arith.constant 0 : index
    %9 = vector.load %arg3[%c1_5, %c0_6, %c0_7] : memref<4x16x128xbf16, #tpu.memory_space<vmem>>, vector<1x16x128xbf16>
    %10 = vector.shape_cast %9 : vector<1x16x128xbf16> to vector<16x128xbf16>
    %11 = arith.extf %10 : vector<16x128xbf16> to vector<16x128xf32>
    %c0_8 = arith.constant 0 : index
    %c1_9 = arith.constant 1 : index
    %12 = memref.load %arg2[%c0_8, %c1_9] : memref<2x4xf32, #tpu.memory_space<smem>>
    %13 = vector.broadcast %12 : f32 to vector<16x128xf32>
    %14 = arith.mulf %13, %11 : vector<16x128xf32>
    %15 = arith.addf %5, %14 : vector<16x128xf32>
    %c1_10 = arith.constant 1 : index
    %c1_11 = arith.constant 1 : index
    %16 = memref.load %arg2[%c1_10, %c1_11] : memref<2x4xf32, #tpu.memory_space<smem>>
    %17 = vector.broadcast %16 : f32 to vector<16x128xf32>
    %18 = arith.mulf %17, %11 : vector<16x128xf32>
    %19 = arith.addf %8, %18 : vector<16x128xf32>
    %c2 = arith.constant 2 : index
    %c0_12 = arith.constant 0 : index
    %c0_13 = arith.constant 0 : index
    %20 = vector.load %arg3[%c2, %c0_12, %c0_13] : memref<4x16x128xbf16, #tpu.memory_space<vmem>>, vector<1x16x128xbf16>
    %21 = vector.shape_cast %20 : vector<1x16x128xbf16> to vector<16x128xbf16>
    %22 = arith.extf %21 : vector<16x128xbf16> to vector<16x128xf32>
    %c0_14 = arith.constant 0 : index
    %c2_15 = arith.constant 2 : index
    %23 = memref.load %arg2[%c0_14, %c2_15] : memref<2x4xf32, #tpu.memory_space<smem>>
    %24 = vector.broadcast %23 : f32 to vector<16x128xf32>
    %25 = arith.mulf %24, %22 : vector<16x128xf32>
    %26 = arith.addf %15, %25 : vector<16x128xf32>
    %c1_16 = arith.constant 1 : index
    %c2_17 = arith.constant 2 : index
    %27 = memref.load %arg2[%c1_16, %c2_17] : memref<2x4xf32, #tpu.memory_space<smem>>
    %28 = vector.broadcast %27 : f32 to vector<16x128xf32>
    %29 = arith.mulf %28, %22 : vector<16x128xf32>
    %30 = arith.addf %19, %29 : vector<16x128xf32>
    %c3 = arith.constant 3 : index
    %c0_18 = arith.constant 0 : index
    %c0_19 = arith.constant 0 : index
    %31 = vector.load %arg3[%c3, %c0_18, %c0_19] : memref<4x16x128xbf16, #tpu.memory_space<vmem>>, vector<1x16x128xbf16>
    %32 = vector.shape_cast %31 : vector<1x16x128xbf16> to vector<16x128xbf16>
    %33 = arith.extf %32 : vector<16x128xbf16> to vector<16x128xf32>
    %c0_20 = arith.constant 0 : index
    %c3_21 = arith.constant 3 : index
    %34 = memref.load %arg2[%c0_20, %c3_21] : memref<2x4xf32, #tpu.memory_space<smem>>
    %35 = vector.broadcast %34 : f32 to vector<16x128xf32>
    %36 = arith.mulf %35, %33 : vector<16x128xf32>
    %37 = arith.addf %26, %36 : vector<16x128xf32>
    %c1_22 = arith.constant 1 : index
    %c3_23 = arith.constant 3 : index
    %38 = memref.load %arg2[%c1_22, %c3_23] : memref<2x4xf32, #tpu.memory_space<smem>>
    %39 = vector.broadcast %38 : f32 to vector<16x128xf32>
    %40 = arith.mulf %39, %33 : vector<16x128xf32>
    %41 = arith.addf %30, %40 : vector<16x128xf32>
    %c0_24 = arith.constant 0 : index
    %c0_25 = arith.constant 0 : index
    %c0_26 = arith.constant 0 : index
    %42 = vector.load %arg4[%c0_24, %c0_25, %c0_26] : memref<2x16x128xf32, #tpu.memory_space<vmem>>, vector<1x16x128xf32>
    %43 = vector.shape_cast %42 : vector<1x16x128xf32> to vector<16x128xf32>
    %44 = vector.shape_cast %37 : vector<16x128xf32> to vector<1x16x128xf32>
    tpu.vector_store %arg4[%c0_24, %c0_25, %c0_26], %44 {strides = array<i32>} : memref<2x16x128xf32, #tpu.memory_space<vmem>>, vector<1x16x128xf32>,
    %c1_27 = arith.constant 1 : index
    %c0_28 = arith.constant 0 : index
    %c0_29 = arith.constant 0 : index
    %45 = vector.load %arg4[%c1_27, %c0_28, %c0_29] : memref<2x16x128xf32, #tpu.memory_space<vmem>>, vector<1x16x128xf32>
    %46 = vector.shape_cast %45 : vector<1x16x128xf32> to vector<16x128xf32>
    %47 = vector.shape_cast %41 : vector<16x128xf32> to vector<1x16x128xf32>
    tpu.vector_store %arg4[%c1_27, %c0_28, %c0_29], %47 {strides = array<i32>} : memref<2x16x128xf32, #tpu.memory_space<vmem>>, vector<1x16x128xf32>,
    return
  }
  func.func @transform_0(%arg0: i32, %arg1: i32) -> (i32, i32) {
    %c0_i32 = arith.constant 0 : i32
    %c0_i32_0 = arith.constant 0 : i32
    %c0_i32_1 = arith.constant 0 : i32
    return %c0_i32, %c0_i32_0 : i32, i32
  }
  func.func @transform_1(%arg0: i32, %arg1: i32) -> (i32, i32, i32) {
    %c0_i32 = arith.constant 0 : i32
    %c0_i32_0 = arith.constant 0 : i32
    return %c0_i32, %arg0, %arg1 : i32, i32, i32
  }
  func.func @transform_2(%arg0: i32, %arg1: i32) -> (i32, i32, i32) {
    %c0_i32 = arith.constant 0 : i32
    %c0_i32_0 = arith.constant 0 : i32
    return %c0_i32, %arg0, %arg1 : i32, i32, i32
  }
}

</mosaic_0001>

<bundles_post_ra>
// kernel: tpu_custom_call.1
= control target key start
LH: loop header
LB: loop body
LE: loop exit
PB: predicated region body
PF: predicated region fallthrough
CT: control target
= control target key end

     0   :  { %7 = vsyncpa [#allocation5], 0  ;;  %s283_s0 = inlined_call_operand.hbm [shape: f32[2,4], index: 0, kind: input, shape index: {}]   ;;  %s284_s1 = inlined_call_operand.hbm [shape: bf16[4,16,128], index: 1, kind: input, shape index: {}]   ;;  %s285_s2 = inlined_call_operand.hbm [shape: f32[2,16,128], index: 2, kind: output, shape index: {}]  }
   0x1   :  { %8 = vsyncpa [#allocation3], 0 }
   0x2   :  { %9 = vsyncpa [#allocation4], 0  ;;  %s153_s11 = scalar_lea.hbm %s283_s0, 32 }
   0x3   :  { %p154_p0 = scmp.ne.s32.totalorder %s283_s0, %s153_s11  ;;  %p157_p1 = scmp.lt.u32.totalorder %s153_s11, %s283_s0 }
   0x5   :  { %p159_p2 = pnand %p157_p1, %p154_p0 }
   0x7   :  { %162 = shalt.err (!%p159_p2)
}
   0x8   :  { %s213_s16 = smov [#allocation2]   ;;  %s214_s19 = smov [#allocation6]  }
   0x9   :  { %17 = dma.hbm_to_smem %s283_s0, 32, %s213_s16, [#allocation5]  }
   0xa   :  { %s23_s20 = sshll.u32 %s214_s19, 4  ;;  %s163_s23 = scalar_lea.hbm %s284_s1, 512  ;;  %s24_s20 = int_to_ptr.vmem [resolvable:$true] %s23_s20 }
   0xb   :  { %p164_p3 = scmp.ne.s32.totalorder %s284_s1, %s163_s23  ;;  %p167_p4 = scmp.lt.u32.totalorder %s163_s23, %s284_s1 }
   0xd   :  { %p169_p5 = pnand %p167_p4, %p164_p3 }
   0xf   :  { %172 = shalt.err (!%p169_p5)
}
  0x10   :  { %s173_s28 = scalar_lea.vmem %s24_s20, 512  ;;  %p178_p7 = scmp.lt.s32.totalorder %s24_s20, %s24_s20 }
  0x11   :  { %p174_p6 = scmp.ne.s32.totalorder %s24_s20, %s173_s28  ;;  %p179_p8 = scmp.lt.s32.totalorder %s173_s28, %s173_s28 }
  0x13   :  { %p180_p9 = por %p179_p8, %p178_p7 }
  0x15   :  { %p181_p10 = pnand %p180_p9, %p174_p6 }
  0x17   :  { %184 = shalt.err (!%p181_p10)
}
  0x18   :  { %s215_s0 = smov 64   ;;  %s216_s29 = smov 4  }
  0x19   :  { %29 = dma.hbm_to_vmem [thread:$0]  %s284_s1, 512, %s24_s20, [#allocation3], %s215_s0, %s215_s0, %s216_s29  }
  0x1a   :  { %207 = dma.done.wait [#allocation5], 32  }
  0x1b   :  { %208 = vsyncadd [#allocation5], 4294967264 }
  0x1c   :  { %209 = dma.done.wait [#allocation3], 512  }
  0x1d   :  { %210 = vsyncadd [#allocation3], 4294966784 }
  0x1e   :  { %36 = sfence }
  0x1f   :  { %v131_v0 = vld [vmem:[#allocation6] sm:$0xff]   ;;  %s41_s4 = sld [smem:[#allocation2]]  ;;  %v135_v1 = vld [vmem:[#allocation6 + $0x8] sm:$0xff]   ;;  %s124_s5 = sld [smem:[#allocation2 + $0x1]]  ;;  %v139_v2 = vld [vmem:[#allocation6 + $0x10] sm:$0xff]  }
  0x20   :  { %s126_s6 = sld [smem:[#allocation2 + $0x2]]  ;;  %v143_v3 = vld [vmem:[#allocation6 + $0x18] sm:$0xff]   ;;  %s128_s7 = sld [smem:[#allocation2 + $0x3]]  ;;  %v132_v4 = vunpack.c.l.bf16 %v131_v0  ;;  %v136_v5 = vunpack.c.l.bf16 %v135_v1  ;;  %v140_v6 = vunpack.c.l.bf16 %v139_v2  ;;  %v133_v8 = vunpack.c.h.bf16 %v131_v0 }
  0x21   :  { %s259_s8 = sld [smem:[#allocation2 + $0x80]]  ;;  %s261_s9 = sld [smem:[#allocation2 + $0x81]]  ;;  %v144_v7 = vunpack.c.l.bf16 %v143_v3  ;;  %v137_v9 = vunpack.c.h.bf16 %v135_v1  ;;  %v141_v10 = vunpack.c.h.bf16 %v139_v2  ;;  %v145_v11 = vunpack.c.h.bf16 %v143_v3 }
  0x22   :  { %s263_s1 = sld [smem:[#allocation2 + $0x82]]  ;;  %s265_s10 = sld [smem:[#allocation2 + $0x83]] }
  0x23   :  { %s217_s11 = smov [#allocation7]  }
  0x24   :  { %s110_s12 = sshll.u32 %s217_s11, 4  ;;  %s111_s12 = int_to_ptr.vmem [resolvable:$true] %s110_s12 }
  0x25   :  { %v42_v12 = vstv %s41_s4  ;;  %v55_v13 = vstv %s124_s5  ;;  %s185_s13 = scalar_lea.vmem %s111_s12, 512  ;;  %p190_p12 = scmp.lt.s32.totalorder %s111_s12, %s111_s12 }
  0x26   :  { %v43_v14 = vmul.f32 %v132_v4, %v42_v12  ;;  %v56_v15 = vmul.f32 %v136_v5, %v55_v13  ;;  %v72_v16 = vstv %s126_s6  ;;  %v89_v17 = vstv %s128_s7  ;;  %p186_p11 = scmp.ne.s32.totalorder %s111_s12, %s185_s13  ;;  %p191_p13 = scmp.lt.s32.totalorder %s185_s13, %s185_s13 }
  0x27   :  { %v73_v18 = vmul.f32 %v140_v6, %v72_v16  ;;  %v90_v19 = vmul.f32 %v144_v7, %v89_v17  ;;  %v44_v20 = vmul.f32 %v133_v8, %v42_v12  ;;  %v57_v21 = vmul.f32 %v137_v9, %v55_v13 }
  0x28   :  { %v58_v22 = vadd.f32 %v56_v15, %v43_v14  ;;  %v74_v23 = vmul.f32 %v141_v10, %v72_v16  ;;  %v91_v24 = vmul.f32 %v145_v11, %v89_v17  ;;  %v46_v25 = vstv %s259_s8  ;;  %p192_p0 = por %p191_p13, %p190_p12 }
  0x29   :  { %v59_v26 = vadd.f32 %v57_v21, %v44_v20  ;;  %v47_v27 = vmul.f32 %v132_v4, %v46_v25  ;;  %v61_v28 = vstv %s261_s9  ;;  %v78_v29 = vstv %s263_s1 }
  0x2a   :  { %v75_v30 = vadd.f32 %v73_v18, %v58_v22  ;;  %v62_v31 = vmul.f32 %v136_v5, %v61_v28  ;;  %v79_v32 = vmul.f32 %v140_v6, %v78_v29  ;;  %v95_v33 = vstv %s265_s10  ;;  %p193_p1 = pnand %p192_p0, %p186_p11 }
  0x2b   :  { %v76_v34 = vadd.f32 %v74_v23, %v59_v26  ;;  %v48_v35 = vmul.f32 %v133_v8, %v46_v25  ;;  %v63_v36 = vmul.f32 %v137_v9, %v61_v28  ;;  %v96_v39 = vmul.f32 %v144_v7, %v95_v33 }
  0x2c   :  { %v92_v37 = vadd.f32 %v90_v19, %v75_v30  ;;  %v64_v38 = vadd.f32 %v62_v31, %v47_v27  ;;  %v80_v40 = vmul.f32 %v141_v10, %v78_v29  ;;  %v97_v43 = vmul.f32 %v145_v11, %v95_v33 }
  0x2d   :  { %v93_v41 = vadd.f32 %v91_v24, %v76_v34  ;;  %v65_v42 = vadd.f32 %v63_v36, %v48_v35 }
  0x2e   :  { %100 = vst [vmem:[#allocation7] sm:$0xff] %v92_v37  ;;  %v81_v44 = vadd.f32 %v79_v32, %v64_v38 }
  0x2f   :  { %101 = vst [vmem:[#allocation7 + $0x8] sm:$0xff] %v93_v41  ;;  %v82_v45 = vadd.f32 %v80_v40, %v65_v42 }
  0x30   :  { %v98_v46 = vadd.f32 %v96_v39, %v81_v44 }
  0x31   :  { %v99_v47 = vadd.f32 %v97_v43, %v82_v45 }
  0x32   :  { %103 = vst [vmem:[#allocation7 + $0x10] sm:$0xff] %v98_v46 }
  0x33   :  { %104 = vst [vmem:[#allocation7 + $0x18] sm:$0xff] %v99_v47 }
  0x34   :  { %196 = shalt.err (!%p193_p1)
}
  0x35   :  { %s197_s16 = scalar_lea.hbm %s285_s2, 512 }
  0x36   :  { %p198_p2 = scmp.ne.s32.totalorder %s285_s2, %s197_s16  ;;  %p201_p3 = scmp.lt.u32.totalorder %s197_s16, %s285_s2 }
  0x38   :  { %p203_p4 = pnand %p201_p3, %p198_p2 }
  0x3a   :  { %206 = shalt.err (!%p203_p4)
}
  0x3b   :  { %s218_s21 = smov 128   ;;  %s219_s22 = smov 8  }
  0x3c   :  { %116 = dma.vmem_to_hbm [thread:$0]  %s111_s12, 512, %s285_s2, [#allocation4], %s218_s21, %s218_s21, %s219_s22  }
  0x3d   :  { %211 = dma.done.wait [#allocation4], 512  }
  0x3e   :  { %212 = vsyncadd [#allocation4], 4294966784 }
  0x3f   :  { %120 = vsyncpa [#allocation3], 1 }
  0x40   :  { %121 = vsyncpa [#allocation4], 1 }
  0x41   :  { %122 = vsyncpa [#allocation5], 1 }

</bundles_post_ra>
